<compile_context>
chip_gen: v5e
topology: v5e:2x2
jax: 0.10.0
libtpu: 0.0.40
codegen_flags: <defaults>
</compile_context>

<pallas_src>
import functools

import jax
import jax.numpy as jnp
from jax.experimental import pallas as pl
from jax.experimental.pallas import tpu as pltpu

ALPHA = 0.25
GAMMA = 2.0
COLS = 512          # lane-dense last dim (multiple of 128)
MAX_BLOCK_ROWS = 512  # 512 x 512 f32 tile = 1 MiB per input


def _round_up(x, m):
    return ((x + m - 1) // m) * m


def _int_power(v, g):
    """(1 - pt)**g for non-negative integer g via repeated multiplies (VPU only)."""
    result = None
    base = v
    while g:
        if g & 1:
            result = base if result is None else result * base
        g >>= 1
        if g:
            base = base * base
    return jnp.ones_like(v) if result is None else result


def _focal_loss_kernel(x_ref, t_ref, out_ref, *, alpha, gamma, n_valid,
                       block_rows, cols, masked):
    x = x_ref[...].astype(jnp.float32)
    t = t_ref[...].astype(jnp.float32)

    # Numerically stable logits form of BCE(sigmoid(x), t):
    #   log(sigmoid(x))     = x - softplus(x)
    #   log(1 - sigmoid(x)) = -softplus(x)
    # softplus(x) = max(x, 0) + log1p(exp(-|x|))   -> 2 EUP ops/elem
    sp = jnp.maximum(x, 0.0) + jnp.log1p(jnp.exp(-jnp.abs(x)))
    log_p = jnp.maximum(x - sp, -100.0)    # PyTorch clamps log() at -100
    log_1mp = jnp.maximum(-sp, -100.0)
    ce = -(t * log_p + (1.0 - t) * log_1mp)

    # pt = exp(-ce)                                -> 1 EUP op/elem
    pt = jnp.exp(-ce)

    # alpha_tensor = where(target == 1, alpha, 1 - alpha)
    alpha_t = jnp.where(t == 1.0, alpha, 1.0 - alpha)

    one_minus_pt = 1.0 - pt
    if float(gamma).is_integer() and gamma >= 0:
        pow_term = _int_power(one_minus_pt, int(gamma))   # gamma=2 -> 1 multiply
    else:
        pow_term = jnp.power(one_minus_pt, gamma)

    focal = alpha_t * pow_term * ce

    if masked:
        # Zero out padded elements so the mean is unbiased.  Only the last tile
        # actually contains padding, but the mask is cheap VPU work.
        i = pl.program_id(0)
        row_ids = jax.lax.broadcasted_iota(jnp.int32, (block_rows, cols), 0)
        col_ids = jax.lax.broadcasted_iota(jnp.int32, (block_rows, cols), 1)
        flat = i * (block_rows * cols) + row_ids * cols + col_ids
        focal = jnp.where(flat < n_valid, focal, 0.0)

    # VPU-only partial reduction: (block_rows, cols) -> (block_rows//8, 8, cols)
    # split exactly at the sublane-tile boundary (free reshape), then vadd over
    # the leading axis.  The expensive cross-lane reduce happens once, outside.
    partial = focal.reshape(-1, 8, cols).sum(axis=0)
    out_ref[0] = partial


def focal_loss(x, target, *, alpha=ALPHA, gamma=GAMMA, reduction="mean"):
    """Focal loss matching the PyTorch module (reduction = 'mean' or 'sum')."""
    assert x.shape == target.shape
    if reduction not in ("mean", "sum"):
        # TODO(synk): reduction='none' (per-element output) not implemented here.
        raise NotImplementedError(f"Reduction {reduction} not implemented.")

    n = x.size
    xf = x.reshape(-1)
    tf = target.reshape(-1)

    rows_needed = (n + COLS - 1) // COLS
    block_rows = min(MAX_BLOCK_ROWS, _round_up(max(rows_needed, 1), 8))
    total_rows = _round_up(rows_needed, block_rows)
    padded_n = total_rows * COLS
    masked = padded_n != n
    if masked:
        pad = padded_n - n
        xf = jnp.pad(xf, (0, pad))
        tf = jnp.pad(tf, (0, pad))

    x2 = xf.reshape(total_rows, COLS)
    t2 = tf.reshape(total_rows, COLS)
    num_blocks = total_rows // block_rows

    kernel = functools.partial(
        _focal_loss_kernel,
        alpha=float(alpha),
        gamma=float(gamma),
        n_valid=n,
        block_rows=block_rows,
        cols=COLS,
        masked=masked,
    )

    partials = pl.pallas_call(
        kernel,
        out_shape=jax.ShapeDtypeStruct((num_blocks, 8, COLS), jnp.float32),
        grid_spec=pltpu.PrefetchScalarGridSpec(
            num_scalar_prefetch=0,
            grid=(num_blocks,),
            in_specs=[
                pl.BlockSpec((block_rows, COLS), lambda i: (i, 0)),
                pl.BlockSpec((block_rows, COLS), lambda i: (i, 0)),
            ],
            out_specs=pl.BlockSpec((1, 8, COLS), lambda i: (i, 0, 0)),
        ),
        compiler_params=pltpu.CompilerParams(
            dimension_semantics=("parallel",),  # no carried state -> megacore OK
        ),
    )(x2, t2)

    total = jnp.sum(partials)
    if reduction == "mean":
        return total / jnp.float32(n)
    return total


def focal_loss_ref(x, target, *, alpha=ALPHA, gamma=GAMMA):
    """Pure-JAX reference mirroring the PyTorch module exactly."""
    p = jax.nn.sigmoid(x.astype(jnp.float32))
    t = target.astype(jnp.float32)
    log_p = jnp.maximum(jnp.log(p), -100.0)
    log_1mp = jnp.maximum(jnp.log(1.0 - p), -100.0)
    ce = -(t * log_p + (1.0 - t) * log_1mp)
    pt = jnp.exp(-ce)
    alpha_t = jnp.where(t == 1.0, alpha, 1.0 - alpha)
    focal = alpha_t * (1.0 - pt) ** gamma * ce
    return focal.mean()


if __name__ == "__main__":
    key = jax.random.PRNGKey(0)
    kx, kt = jax.random.split(key)
    # NCHW-style logits and binary targets, B=2, C=4, H=W=16
    x = jax.random.normal(kx, (2, 4, 16, 16), dtype=jnp.float32)
    target = jax.random.bernoulli(kt, 0.5, (2, 4, 16, 16)).astype(jnp.float32)

    out = focal_loss(x, target)
    out = jax.block_until_ready(out)

    ref = focal_loss_ref(x, target)
    assert jnp.allclose(out, ref, atol=1e-5, rtol=1e-5), (out, ref)
    print("KERNEL_OK")
</pallas_src>

<mosaic_0001>
module attributes {stable_mosaic.version = 11 : i64} {
  func.func @_focal_loss_kernel(%arg0: i32, %arg1: memref<8x512xf32, #tpu.memory_space<vmem>>, %arg2: memref<8x512xf32, #tpu.memory_space<vmem>>, %arg3: memref<1x8x512xf32, #tpu.memory_space<vmem>>) attributes {dimension_semantics = [#tpu.dimension_semantics<parallel>], iteration_bounds = array<i64: 1>, scalar_prefetch = 0 : i64, scratch_operands = 0 : i64, tpu.core_type = #tpu.core_type<tc>, window_params = [{transform_indices = @transform_0, window_bounds = array<i64: 8, 512>}, {transform_indices = @transform_1, window_bounds = array<i64: 8, 512>}, {transform_indices = @transform_2, window_bounds = array<i64: 1, 8, 512>}]} {
    %c0 = arith.constant 0 : index
    %c0_0 = arith.constant 0 : index
    %0 = vector.load %arg1[%c0, %c0_0] : memref<8x512xf32, #tpu.memory_space<vmem>>, vector<8x512xf32>
    %c0_1 = arith.constant 0 : index
    %c0_2 = arith.constant 0 : index
    %1 = vector.load %arg2[%c0_1, %c0_2] : memref<8x512xf32, #tpu.memory_space<vmem>>, vector<8x512xf32>
    %cst = arith.constant 0.000000e+00 : f32
    %2 = vector.broadcast %cst : f32 to vector<8x512xf32>
    %3 = arith.maximumf %0, %2 : vector<8x512xf32>
    %4 = math.absf %0 : vector<8x512xf32>
    %cst_3 = arith.constant 0.000000e+00 : f32
    %5 = vector.broadcast %cst_3 : f32 to vector<8x512xf32>
    %6 = arith.subf %5, %4 : vector<8x512xf32>
    %7 = math.exp %6 : vector<8x512xf32>
    %8 = math.log1p %7 : vector<8x512xf32>
    %9 = arith.addf %3, %8 : vector<8x512xf32>
    %10 = arith.subf %0, %9 : vector<8x512xf32>
    %cst_4 = arith.constant -1.000000e+02 : f32
    %11 = vector.broadcast %cst_4 : f32 to vector<8x512xf32>
    %12 = arith.maximumf %10, %11 : vector<8x512xf32>
    %cst_5 = arith.constant 0.000000e+00 : f32
    %13 = vector.broadcast %cst_5 : f32 to vector<8x512xf32>
    %14 = arith.subf %13, %9 : vector<8x512xf32>
    %cst_6 = arith.constant -1.000000e+02 : f32
    %15 = vector.broadcast %cst_6 : f32 to vector<8x512xf32>
    %16 = arith.maximumf %14, %15 : vector<8x512xf32>
    %17 = arith.mulf %1, %12 : vector<8x512xf32>
    %cst_7 = arith.constant 1.000000e+00 : f32
    %18 = vector.broadcast %cst_7 : f32 to vector<8x512xf32>
    %19 = arith.subf %18, %1 : vector<8x512xf32>
    %20 = arith.mulf %19, %16 : vector<8x512xf32>
    %21 = arith.addf %17, %20 : vector<8x512xf32>
    %cst_8 = arith.constant 0.000000e+00 : f32
    %22 = vector.broadcast %cst_8 : f32 to vector<8x512xf32>
    %23 = arith.subf %22, %21 : vector<8x512xf32>
    %cst_9 = arith.constant 0.000000e+00 : f32
    %24 = vector.broadcast %cst_9 : f32 to vector<8x512xf32>
    %25 = arith.subf %24, %23 : vector<8x512xf32>
    %26 = math.exp %25 : vector<8x512xf32>
    %cst_10 = arith.constant 1.000000e+00 : f32
    %27 = vector.broadcast %cst_10 : f32 to vector<8x512xf32>
    %28 = arith.cmpf oeq, %1, %27 : vector<8x512xf32>
    %cst_11 = arith.constant 2.500000e-01 : f32
    %cst_12 = arith.constant 7.500000e-01 : f32
    %29 = vector.broadcast %cst_11 : f32 to vector<8x512xf32>
    %30 = vector.broadcast %cst_12 : f32 to vector<8x512xf32>
    %31 = arith.select %28, %29, %30 : vector<8x512xi1>, vector<8x512xf32>
    %cst_13 = arith.constant 1.000000e+00 : f32
    %32 = vector.broadcast %cst_13 : f32 to vector<8x512xf32>
    %33 = arith.subf %32, %26 : vector<8x512xf32>
    %34 = arith.mulf %33, %33 : vector<8x512xf32>
    %35 = arith.mulf %31, %34 : vector<8x512xf32>
    %36 = arith.mulf %35, %23 : vector<8x512xf32>
    %37 = tpu.iota {dimensions = array<i32: 0>} : vector<8x512xi32>
    %38 = tpu.iota {dimensions = array<i32: 1>} : vector<8x512xi32>
    %c4096_i32 = arith.constant 4096 : i32
    %39 = arith.muli %arg0, %c4096_i32 : i32
    %c512_i32 = arith.constant 512 : i32
    %40 = vector.broadcast %c512_i32 : i32 to vector<8x512xi32>
    %41 = arith.muli %37, %40 : vector<8x512xi32>
    %42 = vector.broadcast %39 : i32 to vector<8x512xi32>
    %43 = arith.addi %42, %41 : vector<8x512xi32>
    %44 = arith.addi %43, %38 : vector<8x512xi32>
    %c2048_i32 = arith.constant 2048 : i32
    %45 = vector.broadcast %c2048_i32 : i32 to vector<8x512xi32>
    %46 = arith.cmpi slt, %44, %45 : vector<8x512xi32>
    %cst_14 = arith.constant 0.000000e+00 : f32
    %47 = vector.broadcast %cst_14 : f32 to vector<8x512xf32>
    %48 = arith.select %46, %36, %47 : vector<8x512xi1>, vector<8x512xf32>
    %49 = vector.shape_cast %48 : vector<8x512xf32> to vector<1x8x512xf32>
    %cst_15 = arith.constant dense<0.000000e+00> : vector<8x512xf32>
    %50 = vector.multi_reduction <add>, %49, %cst_15 [0] : vector<1x8x512xf32> to vector<8x512xf32>
    %c0_16 = arith.constant 0 : index
    %c0_17 = arith.constant 0 : index
    %c0_18 = arith.constant 0 : index
    %51 = vector.load %arg3[%c0_16, %c0_17, %c0_18] : memref<1x8x512xf32, #tpu.memory_space<vmem>>, vector<1x8x512xf32>
    %52 = vector.shape_cast %51 : vector<1x8x512xf32> to vector<8x512xf32>
    %53 = vector.shape_cast %50 : vector<8x512xf32> to vector<1x8x512xf32>
    tpu.vector_store %arg3[%c0_16, %c0_17, %c0_18], %53 {strides = array<i32>} : memref<1x8x512xf32, #tpu.memory_space<vmem>>, vector<1x8x512xf32>,
    return
  }
  func.func @transform_0(%arg0: i32) -> (i32, i32) {
    %c0_i32 = arith.constant 0 : i32
    %c0_i32_0 = arith.constant 0 : i32
    return %arg0, %c0_i32 : i32, i32
  }
  func.func @transform_1(%arg0: i32) -> (i32, i32) {
    %c0_i32 = arith.constant 0 : i32
    %c0_i32_0 = arith.constant 0 : i32
    return %arg0, %c0_i32 : i32, i32
  }
  func.func @transform_2(%arg0: i32) -> (i32, i32, i32) {
    %c0_i32 = arith.constant 0 : i32
    %c0_i32_0 = arith.constant 0 : i32
    %c0_i32_1 = arith.constant 0 : i32
    return %arg0, %c0_i32, %c0_i32_0 : i32, i32, i32
  }
}

</mosaic_0001>

<bundles_post_ra>
// kernel: tpu_custom_call.1
= control target key start
LH: loop header
LB: loop body
LE: loop exit
PB: predicated region body
PF: predicated region fallthrough
CT: control target
= control target key end

     0   :  { %7 = vsyncpa [#allocation3], 0  ;;  %s424_s0 = inlined_call_operand.hbm [shape: f32[8,512], index: 0, kind: input, shape index: {}]   ;;  %s425_s1 = inlined_call_operand.hbm [shape: f32[8,512], index: 1, kind: input, shape index: {}]   ;;  %s426_s2 = inlined_call_operand.hbm [shape: f32[1,8,512], index: 2, kind: output, shape index: {}]  }
   0x1   :  { %8 = vsyncpa [#allocation6], 0 }
   0x2   :  { %9 = vsyncpa [#allocation4], 0  ;;  %s15_s11 = sshll.u32 %s424_s0, 4  ;;  %s335_s12 = smov [#allocation2]   ;;  %s16_s11 = int_to_ptr.hbm [resolvable:$true] %s15_s11 }
   0x3   :  { %s17_s13 = sshll.u32 %s335_s12, 4  ;;  %s26_s16 = sshll.u32 %s425_s1, 4  ;;  %s18_s13 = int_to_ptr.vmem [resolvable:$true] %s17_s13  ;;  %s27_s16 = int_to_ptr.hbm [resolvable:$true] %s26_s16 }
   0x4   :  { %20 = dma.hbm_to_vmem [thread:$0]  %s16_s11, 512, %s18_s13, [#allocation3]  }
   0x5   :  { %s336_s17 = smov [#allocation5]  }
   0x6   :  { %s28_s18 = sshll.u32 %s336_s17, 4  ;;  %s29_s18 = int_to_ptr.vmem [resolvable:$true] %s28_s18 }
   0x7   :  { %31 = dma.hbm_to_vmem [thread:$0]  %s27_s16, 512, %s29_s18, [#allocation6]  }
   0x8   :  { %329 = dma.done.wait [#allocation3], 512  }
   0x9   :  { %330 = vsyncadd [#allocation3], 4294966784 }
   0xa   :  { %331 = dma.done.wait [#allocation6], 512  }
   0xb   :  { %332 = vsyncadd [#allocation6], 4294966784  ;;  %v360_v0 = vld [vmem:[#allocation2] sm:$0xff]  ;;  %v362_v1 = vld [vmem:[#allocation2 + $0x8] sm:$0xff]  ;;  %s338_s0 = smov [#allocation7]   ;;  %s218_s21 = sshll.u32 %s426_s2, 4  ;;  %s219_s21 = int_to_ptr.hbm [resolvable:$true] %s218_s21 }
   0xc   :  { %v52_v2 = vand.u32 2147483647, %v360_v0  ;;  %v53_v3 = vand.u32 2147483647, %v362_v1  ;;  %v366_v4 = vld [vmem:[#allocation2 + $0x10] sm:$0xff]  ;;  %v368_v5 = vld [vmem:[#allocation2 + $0x18] sm:$0xff] }
   0xd   :  { %v54_v7 = vand.u32 2147483647, %v366_v4  ;;  %v55_v9 = vand.u32 2147483647, %v368_v5  ;;  %v48_v36 = vmax.f32 %v360_v0, 0.0  ;;  %v49_v41 = vmax.f32 %v362_v1, 0.0 }
   0xe   :  { %v56_v6 = vsub.f32 0.0, %v52_v2  ;;  %v57_v8 = vsub.f32 0.0, %v53_v3  ;;  %v378_v43 = vld [vmem:[#allocation5] sm:$0xff]  ;;  %v50_v49 = vmax.f32 %v366_v4, 0.0  ;;  %v385_v52 = vld [vmem:[#allocation5 + $0x8] sm:$0xff]  ;;  %v390_v59 = vld [vmem:[#allocation5 + $0x10] sm:$0xff] }
   0xf   :  { %v58_v11 = vsub.f32 0.0, %v54_v7  ;;  %v59_v13 = vsub.f32 0.0, %v55_v9  ;;  %v128_v57 = vsub.f32 1.0, %v378_v43  ;;  %v51_v60 = vmax.f32 %v368_v5, 0.0  ;;  %s216_s1 = sshll.u32 %s338_s0, 4  ;;  %s217_s1 = int_to_ptr.vmem [resolvable:$true] %s216_s1 }
  0x10   :  { %v60_v10 = vmul.f32 1.442695, %v56_v6  ;;  %v62_v12 = vmul.f32 1.442695, %v57_v8  ;;  %v129_v8 = vsub.f32 1.0, %v385_v52  ;;  %vm156_vm4 = vcmp.eq.f32.partialorder %v378_v43, 1.0 }
  0x11   :  { %v64_v14 = vmul.f32 1.442695, %v58_v11  ;;  %v66_v15 = vmul.f32 1.442695, %v59_v13  ;;  %vm157_vm5 = vcmp.eq.f32.partialorder %v385_v52, 1.0  ;;  %vm158_vm6 = vcmp.eq.f32.partialorder %v390_v59, 1.0 }
  0x12   :  { %233 = vpow2.f32 %v60_v10 }
  0x13   :  { %235 = vpow2.f32 %v62_v12  ;;  %v130_v12 = vsub.f32 1.0, %v390_v59 }
  0x14   :  { %237 = vpow2.f32 %v64_v14 }
  0x15   :  { %239 = vpow2.f32 %v66_v15 }
  0x18   :  { %v234_v16 = vpop.eup %233 }
  0x19   :  { %v236_v17 = vpop.eup %235  ;;  %v68_v18 = vadd.f32 1.0, %v234_v16  ;;  %v71_v19 = vmul.f32 -0.5, %v234_v16  ;;  %v74_v26 = vand.u32 2147483647, %v234_v16 }
  0x1a   :  { %v238_v20 = vpop.eup %237  ;;  %v77_v21 = vadd.f32 1.0, %v236_v17  ;;  %v80_v22 = vmul.f32 -0.5, %v236_v17  ;;  %v83_v29 = vand.u32 2147483647, %v236_v17 }
  0x1b   :  { %v240_v23 = vpop.eup %239  ;;  %241 = vlog2.f32 %v68_v18  ;;  %v72_v24 = vadd.f32 1.0, %v71_v19  ;;  %v86_v25 = vadd.f32 1.0, %v238_v20  ;;  %v89_v28 = vmul.f32 -0.5, %v238_v20 }
  0x1c   :  { %243 = vlog2.f32 %v77_v21  ;;  %v81_v27 = vadd.f32 1.0, %v80_v22  ;;  %v95_v30 = vadd.f32 1.0, %v240_v23  ;;  %v98_v32 = vmul.f32 -0.5, %v240_v23 }
  0x1d   :  { %245 = vlog2.f32 %v86_v25  ;;  %v90_v31 = vadd.f32 1.0, %v89_v28  ;;  %v73_v33 = vmul.f32 %v234_v16, %v72_v24  ;;  %v92_v34 = vand.u32 2147483647, %v238_v20 }
  0x1e   :  { %247 = vlog2.f32 %v95_v30  ;;  %vm75_vm0 = vcmp.lt.f32.partialorder %v74_v26, 0.0004427343  ;;  %v82_v37 = vmul.f32 %v236_v17, %v81_v27  ;;  %v99_v38 = vadd.f32 1.0, %v98_v32  ;;  %v406_v17 = vld [vmem:[#allocation5 + $0x18] sm:$0xff] }
  0x1f   :  { %vm374_vm1 = vcmp.lt.f32.partialorder %v83_v29, 0.0004427343  ;;  %v91_v45 = vmul.f32 %v238_v20, %v90_v31  ;;  %v101_v46 = vand.u32 2147483647, %v240_v23  ;;  %vm381_vm2 = vcmp.lt.f32.partialorder %v92_v34, 0.0004427343 }
  0x20   :  { %v100_v55 = vmul.f32 %v240_v23, %v99_v38  ;;  %v131_v27 = vsub.f32 1.0, %v406_v17  ;;  %vm159_vm7 = vcmp.eq.f32.partialorder %v406_v17, 1.0 }
  0x21   :  { %v242_v35 = vpop.eup %241  ;;  %vm393_vm3 = vcmp.lt.f32.partialorder %v101_v46, 0.0004427343 }
  0x22   :  { %v244_v39 = vpop.eup %243  ;;  %v70_v40 = vmul.f32 0.6931472, %v242_v35 }
  0x23   :  { %v79_v44 = vmul.f32 0.6931472, %v244_v39  ;;  %v246_v47 = vpop.eup %245 }
  0x24   :  { %v76_v48 = vsel %vm75_vm0, %v73_v33, %v70_v40  ;;  %v88_v54 = vmul.f32 0.6931472, %v246_v47  ;;  %v248_v56 = vpop.eup %247 }
  0x25   :  { %v104_v51 = vadd.f32 %v76_v48, %v48_v36  ;;  %v85_v53 = vsel %vm374_vm1, %v82_v37, %v79_v44  ;;  %v97_v3 = vmul.f32 0.6931472, %v248_v56  ;;  %v180_v36 = vlaneseq }
  0x26   :  { %v105_v58 = vadd.f32 %v85_v53, %v49_v41  ;;  %v94_v2 = vsel %vm381_vm2, %v91_v45, %v88_v54 }
  0x27   :  { %v108_v62 = vsub.f32 %v360_v0, %v104_v51  ;;  %v116_v63 = vsub.f32 0.0, %v104_v51  ;;  %v106_v9 = vadd.f32 %v94_v2, %v50_v49  ;;  %v103_v13 = vsel %vm393_vm3, %v100_v55, %v97_v3 }
  0x28   :  { %v109_v6 = vsub.f32 %v362_v1, %v105_v58  ;;  %v117_v7 = vsub.f32 0.0, %v105_v58  ;;  %v107_v19 = vadd.f32 %v103_v13, %v51_v60  ;;  %v181_v45 = vshrl.u32 %v180_v36, 7 }
  0x29   :  { %v112_v10 = vmax.f32 %v108_v62, -100.0  ;;  %v120_v11 = vmax.f32 %v116_v63, -100.0  ;;  %v110_v15 = vsub.f32 %v366_v4, %v106_v9  ;;  %v118_v16 = vsub.f32 0.0, %v106_v9 }
  0x2a   :  { %v113_v14 = vmax.f32 %v109_v6, -100.0  ;;  %v121_v0 = vmax.f32 %v117_v7, -100.0  ;;  %v111_v25 = vsub.f32 %v368_v5, %v107_v19  ;;  %v119_v26 = vsub.f32 0.0, %v107_v19 }
  0x2b   :  { %v124_v1 = vmul.f32 %v112_v10, %v378_v43  ;;  %v132_v18 = vmul.f32 %v128_v57, %v120_v11  ;;  %v114_v22 = vmax.f32 %v110_v15, -100.0  ;;  %v122_v23 = vmax.f32 %v118_v16, -100.0 }
  0x2c   :  { %v125_v20 = vmul.f32 %v113_v14, %v385_v52  ;;  %v133_v21 = vmul.f32 %v129_v8, %v121_v0  ;;  %v115_v31 = vmax.f32 %v111_v25, -100.0  ;;  %v123_v32 = vmax.f32 %v119_v26, -100.0 }
  0x2d   :  { %v136_v24 = vadd.f32 %v132_v18, %v124_v1  ;;  %v126_v4 = vmul.f32 %v114_v22, %v390_v59  ;;  %v134_v29 = vmul.f32 %v130_v12, %v122_v23  ;;  %v183_v47 = vand.u32 127, %v180_v36 }
  0x2e   :  { %v137_v28 = vadd.f32 %v133_v21, %v125_v20  ;;  %v127_v37 = vmul.f32 %v115_v31, %v406_v17  ;;  %v135_v38 = vmul.f32 %v131_v27, %v123_v32  ;;  %v188_v50 = vmul.u32 512, %v181_v45 }
  0x2f   :  { %v140_v30 = vsub.f32 0.0, %v136_v24  ;;  %v138_v34 = vadd.f32 %v134_v29, %v126_v4  ;;  %v184_v53 = vadd.s32 128, %v183_v47  ;;  %v185_v57 = vadd.s32 256, %v183_v47 }
  0x30   :  { %v141_v33 = vsub.f32 0.0, %v137_v28  ;;  %v414_v41 = vadd.f32 %v135_v38, %v127_v37  ;;  %v337_v58 = vmov 0.75   ;;  %v191_v61 = vadd.s32 %v188_v50, %v183_v47 }
  0x31   :  { %v144_v35 = vsub.f32 0.0, %v140_v30  ;;  %v142_v40 = vsub.f32 0.0, %v138_v34  ;;  %v160_v60 = vsel %vm156_vm4, 0.25, %v337_v58  ;;  %v161_v3 = vsel %vm157_vm5, 0.25, %v337_v58 }
  0x32   :  { %v145_v39 = vsub.f32 0.0, %v141_v33  ;;  %v143_v46 = vsub.f32 0.0, %v414_v41  ;;  %v192_v6 = vadd.s32 %v188_v50, %v184_v53  ;;  %v186_v8 = vadd.s32 384, %v183_v47 }
  0x33   :  { %v148_v5 = vmul.f32 1.442695, %v144_v35  ;;  %v146_v44 = vsub.f32 0.0, %v142_v40  ;;  %v162_v10 = vsel %vm158_vm6, 0.25, %v337_v58  ;;  %v193_v52 = vadd.s32 %v188_v50, %v185_v57 }
  0x34   :  { %v150_v42 = vmul.f32 1.442695, %v145_v39  ;;  %v147_v49 = vsub.f32 0.0, %v143_v46  ;;  %vm195_vm8 = vcmp.lt.s32.totalorder %v191_v61, 2048  ;;  %vm196_vm9 = vcmp.lt.s32.totalorder %v192_v6, 2048 }
  0x35   :  { %249 = vpow2.f32 %v148_v5  ;;  %v152_v48 = vmul.f32 1.442695, %v146_v44  ;;  %v163_v16 = vsel %vm159_vm7, 0.25, %v337_v58  ;;  %v194_v1 = vadd.s32 %v188_v50, %v186_v8 }
  0x36   :  { %251 = vpow2.f32 %v150_v42  ;;  %v154_v51 = vmul.f32 1.442695, %v147_v49  ;;  %vm197_vm10 = vcmp.lt.s32.totalorder %v193_v52, 2048 }
  0x37   :  { %253 = vpow2.f32 %v152_v48  ;;  %vm198_vm11 = vcmp.lt.s32.totalorder %v194_v1, 2048 }
  0x38   :  { %255 = vpow2.f32 %v154_v51 }
  0x3b   :  { %v250_v54 = vpop.eup %249 }
  0x3c   :  { %v252_v55 = vpop.eup %251  ;;  %v164_v56 = vsub.f32 1.0, %v250_v54 }
  0x3d   :  { %v165_v62 = vsub.f32 1.0, %v252_v55  ;;  %v254_v63 = vpop.eup %253 }
  0x3e   :  { %v168_v2 = vmul.f32 %v164_v56, %v164_v56  ;;  %v166_v43 = vsub.f32 1.0, %v254_v63  ;;  %v256_v11 = vpop.eup %255 }
  0x3f   :  { %v169_v7 = vmul.f32 %v165_v62, %v165_v62  ;;  %v167_v0 = vsub.f32 1.0, %v256_v11 }
  0x40   :  { %v172_v9 = vmul.f32 %v168_v2, %v160_v60  ;;  %v170_v13 = vmul.f32 %v166_v43, %v166_v43 }
  0x41   :  { %v173_v12 = vmul.f32 %v169_v7, %v161_v3  ;;  %v171_v19 = vmul.f32 %v167_v0, %v167_v0 }
  0x42   :  { %v176_v14 = vmul.f32 %v172_v9, %v140_v30  ;;  %v174_v15 = vmul.f32 %v170_v13, %v162_v10 }
  0x43   :  { %v177_v59 = vmul.f32 %v173_v12, %v141_v33  ;;  %v175_v22 = vmul.f32 %v171_v19, %v163_v16 }
  0x44   :  { %v199_v18 = vsel %vm195_vm8, %v176_v14, 0.0  ;;  %v178_v21 = vmul.f32 %v174_v15, %v142_v40 }
  0x45   :  { %207 = vst [vmem:[#allocation7] sm:$0xff] %v199_v18  ;;  %v200_v20 = vsel %vm196_vm9, %v177_v59, 0.0  ;;  %v179_v23 = vmul.f32 %v175_v22, %v143_v46 }
  0x46   :  { %208 = vst [vmem:[#allocation7 + $0x8] sm:$0xff] %v200_v20  ;;  %v201_v17 = vsel %vm197_vm10, %v178_v21, 0.0 }
  0x47   :  { %209 = vst [vmem:[#allocation7 + $0x10] sm:$0xff] %v201_v17  ;;  %v202_v24 = vsel %vm198_vm11, %v179_v23, 0.0 }
  0x48   :  { %210 = vst [vmem:[#allocation7 + $0x18] sm:$0xff] %v202_v24 }
  0x49   :  { %221 = dma.vmem_to_hbm [thread:$0]  %s217_s1, 512, %s219_s21, [#allocation4]  }
  0x4a   :  { %333 = dma.done.wait [#allocation4], 512  }
  0x4b   :  { %334 = vsyncadd [#allocation4], 4294966784 }
  0x4c   :  { %226 = vsyncpa [#allocation3], 1 }
  0x4d   :  { %227 = vsyncpa [#allocation6], 1 }
  0x4e   :  { %228 = vsyncpa [#allocation4], 1 }

</bundles_post_ra>
